<compile_context>
chip_gen: v5e
topology: v5e:2x2
jax: 0.10.0
libtpu: 0.0.40
codegen_flags: <defaults>
</compile_context>

<pallas_src>
import functools

import jax
import jax.numpy as jnp
from jax.experimental import pallas as pl
from jax.experimental.pallas import tpu as pltpu

LANES = 128
# 2048 x 128 x 4B = 1 MiB per input block; 2 inputs x 2 pipeline buffers + 1 MiB
# accumulator ~= 5 MiB VMEM -> comfortably under the default scoped-VMEM limit on
# v5e / v6e / v7x.
MAX_TILE_ROWS = 2048


def _exp_loss_sum_kernel(pred_ref, true_ref, out_ref, acc_ref, *, alpha, rows,
                         needs_mask):
    """Accumulates sum(exp(alpha*|t-p|) - 1) over valid rows into acc_ref."""
    i = pl.program_id(0)

    # Zero the vector accumulator on the first grid step.
    @pl.when(i == 0)
    def _():
        acc_ref[...] = jnp.zeros_like(acc_ref)

    p = pred_ref[...].astype(jnp.float32)
    t = true_ref[...].astype(jnp.float32)
    err = jnp.abs(t - p)
    loss = jnp.exp(jnp.float32(alpha) * err) - jnp.float32(1.0)   # EUP exp

    if needs_mask:
        # Only the last block can be ragged; OOB rows read unspecified data, so
        # select (not multiply) forces their contribution to exactly 0.
        tile_rows = acc_ref.shape[0]
        row_ids = i * tile_rows + jax.lax.broadcasted_iota(
            jnp.int32, loss.shape, 0)
        loss = jnp.where(row_ids < rows, loss, jnp.float32(0.0))

    # Pure VPU elementwise accumulation in VMEM; no per-step cross-lane reduce.
    acc_ref[...] += loss

    # Finalize: one cross-lane/sublane reduction, stored as a scalar in SMEM.
    @pl.when(i == pl.num_programs(0) - 1)
    def _():
        out_ref[0, 0] = jnp.sum(acc_ref[...])


def exponential_loss(y_pred, y_true, alpha=0.5):
    assert y_pred.shape == y_true.shape, "y_pred / y_true must match shapes"
    n = y_pred.size

    # Flatten in native dtype (no upcast copy in the wrapper).
    flat_pred = jnp.ravel(y_pred)
    flat_true = jnp.ravel(y_true)

    rows = n // LANES
    n_main = rows * LANES
    rem = n - n_main

    total = jnp.float32(0.0)

    if rows > 0:
        # Lane-aligned bulk as a (rows, 128) view (free reshape when rem == 0).
        pred2d = flat_pred[:n_main].reshape(rows, LANES)
        true2d = flat_true[:n_main].reshape(rows, LANES)

        # Full-dim block for small inputs; capped big block otherwise.
        tile_rows = rows if rows <= MAX_TILE_ROWS else MAX_TILE_ROWS
        grid = (pl.cdiv(rows, tile_rows),)
        needs_mask = (rows % tile_rows) != 0

        kernel = functools.partial(
            _exp_loss_sum_kernel,
            alpha=float(alpha),
            rows=rows,
            needs_mask=needs_mask,
        )

        bulk_sum = pl.pallas_call(
            kernel,
            out_shape=jax.ShapeDtypeStruct((1, 1), jnp.float32),
            grid_spec=pltpu.PrefetchScalarGridSpec(
                num_scalar_prefetch=0,
                grid=grid,
                in_specs=[
                    pl.BlockSpec((tile_rows, LANES), lambda i: (i, 0)),
                    pl.BlockSpec((tile_rows, LANES), lambda i: (i, 0)),
                ],
                out_specs=pl.BlockSpec(
                    (1, 1),
                    lambda i: (0, 0),
                    memory_space=pltpu.MemorySpace.SMEM,
                ),
                scratch_shapes=[pltpu.VMEM((tile_rows, LANES), jnp.float32)],
            ),
            compiler_params=pltpu.CompilerParams(
                dimension_semantics=("arbitrary",),  # sequential reduction axis
            ),
        )(pred2d, true2d)
        total = total + bulk_sum[0, 0]

    if rem:
        # Sub-128 tail (< 128 elements): negligible, handled in plain JAX.
        tail_p = flat_pred[n_main:].astype(jnp.float32)
        tail_t = flat_true[n_main:].astype(jnp.float32)
        total = total + jnp.sum(
            jnp.exp(jnp.float32(alpha) * jnp.abs(tail_t - tail_p))
            - jnp.float32(1.0)
        )

    return total / jnp.float32(n)


if __name__ == "__main__":
    key = jax.random.PRNGKey(0)
    k1, k2 = jax.random.split(key)
    # Small NCHW-like shapes consistent with a regression loss.
    y_pred = jax.random.normal(k1, (2, 4, 16, 16), dtype=jnp.float32)
    y_true = jax.random.normal(k2, (2, 4, 16, 16), dtype=jnp.float32)

    loss = exponential_loss(y_pred, y_true, alpha=0.5)
    jax.block_until_ready(loss)

    # Pure-JAX reference check.
    ref = jnp.mean(jnp.exp(0.5 * jnp.abs(y_true - y_pred)) - 1.0)
    assert jnp.allclose(loss, ref, rtol=1e-5, atol=1e-6), (loss, ref)
    print("KERNEL_OK")
</pallas_src>

<mosaic_0001>
module attributes {stable_mosaic.version = 11 : i64} {
  func.func @_exp_loss_sum_kernel(%arg0: i32, %arg1: memref<16x128xf32, #tpu.memory_space<vmem>>, %arg2: memref<16x128xf32, #tpu.memory_space<vmem>>, %arg3: memref<1x1xf32, #tpu.memory_space<smem>>, %arg4: memref<16x128xf32, #tpu.memory_space<vmem>>) attributes {dimension_semantics = [#tpu.dimension_semantics<arbitrary>], iteration_bounds = array<i64: 1>, scalar_prefetch = 0 : i64, scratch_operands = 1 : i64, tpu.core_type = #tpu.core_type<tc>, window_params = [{transform_indices = @transform_0, window_bounds = array<i64: 16, 128>}, {transform_indices = @transform_1, window_bounds = array<i64: 16, 128>}, {transform_indices = @transform_2, window_bounds = array<i64: 1, 1>}]} {
    %c0_i32 = arith.constant 0 : i32
    %0 = arith.cmpi eq, %arg0, %c0_i32 : i32
    %1 = arith.extui %0 : i1 to i32
    %c0_i32_0 = arith.constant 0 : i32
    %2 = arith.cmpi ne, %1, %c0_i32_0 : i32
    scf.if %2 {
      %cst_11 = arith.constant 0.000000e+00 : f32
      %18 = vector.broadcast %cst_11 : f32 to vector<16x128xf32>
      %c0_12 = arith.constant 0 : index
      %c0_13 = arith.constant 0 : index
      %19 = vector.load %arg4[%c0_12, %c0_13] : memref<16x128xf32, #tpu.memory_space<vmem>>, vector<16x128xf32>
      tpu.vector_store %arg4[%c0_12, %c0_13], %18 {strides = array<i32>} : memref<16x128xf32, #tpu.memory_space<vmem>>, vector<16x128xf32>,
    } else {
    }
    %c0 = arith.constant 0 : index
    %c0_1 = arith.constant 0 : index
    %3 = vector.load %arg1[%c0, %c0_1] : memref<16x128xf32, #tpu.memory_space<vmem>>, vector<16x128xf32>
    %c0_2 = arith.constant 0 : index
    %c0_3 = arith.constant 0 : index
    %4 = vector.load %arg2[%c0_2, %c0_3] : memref<16x128xf32, #tpu.memory_space<vmem>>, vector<16x128xf32>
    %5 = arith.subf %4, %3 : vector<16x128xf32>
    %6 = math.absf %5 : vector<16x128xf32>
    %cst = arith.constant 5.000000e-01 : f32
    %7 = vector.broadcast %cst : f32 to vector<16x128xf32>
    %8 = arith.mulf %7, %6 : vector<16x128xf32>
    %9 = math.exp %8 : vector<16x128xf32>
    %cst_4 = arith.constant 1.000000e+00 : f32
    %10 = vector.broadcast %cst_4 : f32 to vector<16x128xf32>
    %11 = arith.subf %9, %10 : vector<16x128xf32>
    %c0_5 = arith.constant 0 : index
    %c0_6 = arith.constant 0 : index
    %12 = vector.load %arg4[%c0_5, %c0_6] : memref<16x128xf32, #tpu.memory_space<vmem>>, vector<16x128xf32>
    %13 = arith.addf %12, %11 : vector<16x128xf32>
    %c0_7 = arith.constant 0 : index
    %c0_8 = arith.constant 0 : index
    %14 = vector.load %arg4[%c0_7, %c0_8] : memref<16x128xf32, #tpu.memory_space<vmem>>, vector<16x128xf32>
    tpu.vector_store %arg4[%c0_7, %c0_8], %13 {strides = array<i32>} : memref<16x128xf32, #tpu.memory_space<vmem>>, vector<16x128xf32>,
    %c0_i32_9 = arith.constant 0 : i32
    %15 = arith.cmpi eq, %arg0, %c0_i32_9 : i32
    %16 = arith.extui %15 : i1 to i32
    %c0_i32_10 = arith.constant 0 : i32
    %17 = arith.cmpi ne, %16, %c0_i32_10 : i32
    scf.if %17 {
      %c0_11 = arith.constant 0 : index
      %c0_12 = arith.constant 0 : index
      %18 = vector.load %arg4[%c0_11, %c0_12] : memref<16x128xf32, #tpu.memory_space<vmem>>, vector<16x128xf32>
      %19 = vector.shape_cast %18 : vector<16x128xf32> to vector<1x16x128xf32>
      %cst_13 = arith.constant dense<0.000000e+00> : vector<1xf32>
      %20 = vector.multi_reduction <add>, %19, %cst_13 [1, 2] : vector<1x16x128xf32> to vector<1xf32>
      %21 = vector.shape_cast %20 : vector<1xf32> to vector<1x1x1xf32>
      %22 = vector.extract %21[0, 0, 0] : f32 from vector<1x1x1xf32>
      %c0_14 = arith.constant 0 : index
      %c0_15 = arith.constant 0 : index
      %23 = memref.load %arg3[%c0_14, %c0_15] : memref<1x1xf32, #tpu.memory_space<smem>>
      memref.store %22, %arg3[%c0_14, %c0_15] : memref<1x1xf32, #tpu.memory_space<smem>>
    } else {
    }
    return
  }
  func.func @transform_0(%arg0: i32) -> (i32, i32) {
    %c0_i32 = arith.constant 0 : i32
    %c0_i32_0 = arith.constant 0 : i32
    return %arg0, %c0_i32 : i32, i32
  }
  func.func @transform_1(%arg0: i32) -> (i32, i32) {
    %c0_i32 = arith.constant 0 : i32
    %c0_i32_0 = arith.constant 0 : i32
    return %arg0, %c0_i32 : i32, i32
  }
  func.func @transform_2(%arg0: i32) -> (i32, i32) {
    %c0_i32 = arith.constant 0 : i32
    %c0_i32_0 = arith.constant 0 : i32
    %c0_i32_1 = arith.constant 0 : i32
    return %c0_i32, %c0_i32_0 : i32, i32
  }
}

</mosaic_0001>

<bundles_post_ra>
// kernel: tpu_custom_call.1
= control target key start
LH: loop header
LB: loop body
LE: loop exit
PB: predicated region body
PF: predicated region fallthrough
CT: control target
= control target key end

     0   :  { %7 = vsyncpa [#allocation4], 0  ;;  %s214_s0 = inlined_call_operand.hbm [shape: f32[16,128], index: 0, kind: input, shape index: {}]   ;;  %s215_s1 = inlined_call_operand.hbm [shape: f32[16,128], index: 1, kind: input, shape index: {}]   ;;  %s216_s2 = inlined_call_operand.hbm [shape: f32[1,1], index: 2, kind: output, shape index: {}]  }
   0x1   :  { %8 = vsyncpa [#allocation7], 0 }
   0x2   :  { %9 = vsyncpa [#allocation5], 0  ;;  %s14_s11 = sshll.u32 %s214_s0, 4  ;;  %s185_s12 = smov [#allocation3]   ;;  %s15_s11 = int_to_ptr.hbm [resolvable:$true] %s14_s11 }
   0x3   :  { %s16_s13 = sshll.u32 %s185_s12, 4  ;;  %s27_s16 = sshll.u32 %s215_s1, 4  ;;  %s17_s13 = int_to_ptr.vmem [resolvable:$true] %s16_s13  ;;  %s28_s16 = int_to_ptr.hbm [resolvable:$true] %s27_s16 }
   0x4   :  { %s186_s17 = smov 128   ;;  %s187_s18 = smov 8  }
   0x5   :  { %22 = dma.hbm_to_vmem [thread:$0]  %s15_s11, 256, %s17_s13, [#allocation4], %s186_s17, %s186_s17, %s187_s18  }
   0x6   :  { %s188_s19 = smov [#allocation6]  }
   0x7   :  { %s29_s20 = sshll.u32 %s188_s19, 4  ;;  %s30_s20 = int_to_ptr.vmem [resolvable:$true] %s29_s20 }
   0x8   :  { %35 = dma.hbm_to_vmem [thread:$0]  %s28_s16, 256, %s30_s20, [#allocation7], %s186_s17, %s186_s17, %s187_s18  }
   0x9   :  { %179 = dma.done.wait [#allocation4], 256  }
   0xa   :  { %180 = vsyncadd [#allocation4], 4294967040 }
   0xb   :  { %181 = dma.done.wait [#allocation7], 256  }
   0xc   :  { %182 = vsyncadd [#allocation7], 4294967040  ;;  %v50_v0 = vld [vmem:[#allocation3] sm:$0xff]  ;;  %v51_v1 = vld [vmem:[#allocation3 + $0x8] sm:$0xff]  ;;  %s94_s21 = sshll.u32 %s216_s2, 4  ;;  %s189_s23 = smov [#allocation8]   ;;  %s95_s21 = int_to_ptr.hbm [resolvable:$true] %s94_s21 }
   0xd   :  { %v52_v2 = vld [vmem:[#allocation6] sm:$0xff]  ;;  %v53_v3 = vld [vmem:[#allocation6 + $0x8] sm:$0xff] }
   0xe   :  { %v54_v4 = vsub.f32 %v52_v2, %v50_v0  ;;  %v55_v5 = vsub.f32 %v53_v3, %v51_v1 }
  0x10   :  { %v56_v6 = vand.u32 2147483647, %v54_v4  ;;  %v57_v7 = vand.u32 2147483647, %v55_v5 }
  0x12   :  { %v58_v8 = vmul.f32 0.5, %v56_v6  ;;  %v59_v9 = vmul.f32 0.5, %v57_v7 }
  0x14   :  { %v60_v10 = vmul.f32 1.442695, %v58_v8  ;;  %v62_v11 = vmul.f32 1.442695, %v59_v9 }
  0x16   :  { %115 = vpow2.f32 %v60_v10 }
  0x17   :  { %117 = vpow2.f32 %v62_v11 }
  0x1c   :  { %v116_v12 = vpop.eup %115 }
  0x1d   :  { %v118_v13 = vpop.eup %117  ;;  %v106_v14 = vadd.f32 -1.0, %v116_v12 }
  0x1e   :  { %v107_v15 = vadd.f32 -1.0, %v118_v13 }
  0x20   :  { %v77_v16 = vadd.f32 %v107_v15, %v106_v14 }
  0x22   :  { %78 = vadd.xlane.f32.xlu0 %v77_v16 }
  0x95   :  { %v79_v17 = vpop.xlane.xlu0 %78 }
  0x96   :  { %v80_v18 = vrot.slane %v79_v17, 4 }
  0x98   :  { %v81_v19 = vadd.f32 %v80_v18, %v79_v17 }
  0x9a   :  { %v82_v20 = vrot.slane %v81_v19, 2 }
  0x9c   :  { %v83_v21 = vadd.f32 %v82_v20, %v81_v19 }
  0x9e   :  { %v84_v22 = vrot.slane %v83_v21, 1 }
  0xa0   :  { %v85_v23 = vadd.f32 %v84_v22, %v83_v21 }
  0xa2   :  { %108 = vpush %v85_v23 }
  0xd3   :  { %s109_s22 = spop %108 }
  0xd4   :  { %88 = sst [smem:[#allocation8]] %s109_s22 }
  0xd5   :  { %97 = dma.smem_to_hbm %s189_s23, 16, %s95_s21, [#allocation5]  }
  0xd6   :  { %183 = dma.done.wait [#allocation5], 16  }
  0xd7   :  { %184 = vsyncadd [#allocation5], 4294967280 }
  0xd8   :  { %102 = sfence }
  0xd9   :  { %103 = vsyncpa [#allocation4], 1 }
  0xda   :  { %104 = vsyncpa [#allocation7], 1 }
  0xdb   :  { %105 = vsyncpa [#allocation5], 1 }

</bundles_post_ra>
